<compile_context>
chip_gen: v7x
topology: tpu7x:2x2x1
jax: 0.10.0
libtpu: 0.0.40
codegen_flags: <defaults>
</compile_context>

<pallas_src>
import jax
import jax.numpy as jnp
from jax.experimental import pallas as pl
from jax.experimental.pallas import tpu as pltpu

_SUBLANE = 8  # f32 sublane multiple for the second-to-last block dim


def _round_up(n, m):
    return ((n + m - 1) // m) * m


def _linear_kernel(x_ref, wt_ref, b_ref, o_ref):
    # x: [tb, IN], wt: [IN, OUT] (pre-transposed in the wrapper), b: [1, OUT]
    y = jnp.dot(x_ref[...], wt_ref[...], preferred_element_type=jnp.float32)
    o_ref[...] = (y + b_ref[...]).astype(o_ref.dtype)  # bias folded into store


def simple_model_forward(x, weight, bias, *, block_batch=4096):
    """y = x @ weight.T + bias.  x: [B, IN], weight: [OUT, IN], bias: [OUT]."""
    B, IN = x.shape
    OUT = weight.shape[0]

    # One-time, tiny host-side prep: transpose weight (no in-kernel XLU
    # transpose) and make bias 2-D so its block equals the full array.
    wt = weight.T                 # [IN, OUT]
    b2 = bias.reshape(1, OUT)     # [1, OUT]

    # Realistic cost hint for XLA's scheduler (logical bytes, not padded).
    cost = pl.CostEstimate(
        flops=2 * B * IN * OUT,
        bytes_accessed=4 * (B * IN + B * OUT + IN * OUT + OUT),
        transcendentals=0,
    )

    # Batch tile: multiple of 8, capped so that any sizeable batch produces
    # at least two grid steps (v7x megacore split of the batch axis).
    tb = min(_round_up(block_batch, _SUBLANE),
             max(_SUBLANE, _round_up(pl.cdiv(B, 2), _SUBLANE)))
    grid_b = pl.cdiv(B, tb)

    if grid_b == 1:
        # Tiny batch (B <= 8): whole problem resident in VMEM, no grid /
        # pipeline machinery at all.
        return pl.pallas_call(
            _linear_kernel,
            out_shape=jax.ShapeDtypeStruct((B, OUT), x.dtype),
            cost_estimate=cost,
        )(x, wt, b2)

    # Larger batch: tile only the batch axis with a cdiv grid (partial last
    # block: garbage rows past B are read but their outputs are dropped, and
    # rows are fully independent). Weight/bias stay resident across the grid.
    return pl.pallas_call(
        _linear_kernel,
        out_shape=jax.ShapeDtypeStruct((B, OUT), x.dtype),
        grid=(grid_b,),
        in_specs=[
            pl.BlockSpec((tb, IN), lambda i: (i, 0)),    # full IN => no lane pad
            pl.BlockSpec((IN, OUT), lambda i: (0, 0)),   # resident weight
            pl.BlockSpec((1, OUT), lambda i: (0, 0)),    # resident bias
        ],
        out_specs=pl.BlockSpec((tb, OUT), lambda i: (i, 0)),  # logical width
        compiler_params=pltpu.CompilerParams(
            dimension_semantics=("parallel",)),
        cost_estimate=cost,
    )(x, wt, b2)


if __name__ == "__main__":
    IN_FEATURES, OUT_FEATURES = 5, 3

    key = jax.random.PRNGKey(0)
    kx, kw, kb, kx2, kx3 = jax.random.split(key, 5)

    # Deterministic parameters matching nn.Linear(5, 3) shapes.
    bound = 1.0 / (IN_FEATURES ** 0.5)
    weight = jax.random.uniform(
        kw, (OUT_FEATURES, IN_FEATURES), jnp.float32, -bound, bound)
    bias = jax.random.uniform(
        kb, (OUT_FEATURES,), jnp.float32, -bound, bound)

    # 1) Tiny batch -> gridless whole-array-in-VMEM path.
    x = jax.random.normal(kx, (8, IN_FEATURES), jnp.float32)
    out = jax.block_until_ready(simple_model_forward(x, weight, bias))
    ref = x @ weight.T + bias
    assert out.shape == (8, OUT_FEATURES)
    assert jnp.allclose(out, ref, atol=1e-5, rtol=1e-5)

    # 2) Batch-tiled path (two grid steps, weight/bias resident).
    x2 = jax.random.normal(kx2, (64, IN_FEATURES), jnp.float32)
    out2 = jax.block_until_ready(simple_model_forward(x2, weight, bias))
    ref2 = x2 @ weight.T + bias
    assert out2.shape == (64, OUT_FEATURES)
    assert jnp.allclose(out2, ref2, atol=1e-5, rtol=1e-5)

    # 3) Awkward batch size -> partial last block via the cdiv grid.
    x3 = jax.random.normal(kx3, (50, IN_FEATURES), jnp.float32)
    out3 = jax.block_until_ready(simple_model_forward(x3, weight, bias))
    ref3 = x3 @ weight.T + bias
    assert out3.shape == (50, OUT_FEATURES)
    assert jnp.allclose(out3, ref3, atol=1e-5, rtol=1e-5)

    print("KERNEL_OK")
</pallas_src>

<mosaic_0001>
module attributes {stable_mosaic.version = 11 : i64} {
  func.func @_linear_kernel(%arg0: memref<8x5xf32, #tpu.memory_space<vmem>>, %arg1: memref<5x3xf32, #tpu.memory_space<vmem>>, %arg2: memref<1x3xf32, #tpu.memory_space<vmem>>, %arg3: memref<8x3xf32, #tpu.memory_space<vmem>>) attributes {dimension_semantics = [], scalar_prefetch = 0 : i64, scratch_operands = 0 : i64, tpu.core_type = #tpu.core_type<tc>} {
    %c0 = arith.constant 0 : index
    %c0_0 = arith.constant 0 : index
    %0 = vector.load %arg0[%c0, %c0_0] : memref<8x5xf32, #tpu.memory_space<vmem>>, vector<8x5xf32>
    %c0_1 = arith.constant 0 : index
    %c0_2 = arith.constant 0 : index
    %1 = vector.load %arg1[%c0_1, %c0_2] : memref<5x3xf32, #tpu.memory_space<vmem>>, vector<5x3xf32>
    %cst = arith.constant dense<0.000000e+00> : vector<8x3xf32>
    %2 = tpu.matmul %0, %1, %cst {dimension_numbers = #tpu.dot_dimension_numbers<[1], [0], [0], [1], [0, 0, 1, 1], [], []>} : vector<8x5xf32>, vector<5x3xf32>, vector<8x3xf32> -> vector<8x3xf32>
    %c0_3 = arith.constant 0 : index
    %c0_4 = arith.constant 0 : index
    %3 = vector.load %arg2[%c0_3, %c0_4] : memref<1x3xf32, #tpu.memory_space<vmem>>, vector<1x3xf32>
    %4 = vector.broadcast %3 : vector<1x3xf32> to vector<8x3xf32>
    %5 = arith.addf %2, %4 : vector<8x3xf32>
    %c0_5 = arith.constant 0 : index
    %c0_6 = arith.constant 0 : index
    %6 = vector.load %arg3[%c0_5, %c0_6] : memref<8x3xf32, #tpu.memory_space<vmem>>, vector<8x3xf32>
    tpu.vector_store %arg3[%c0_5, %c0_6], %5 {strides = array<i32>} : memref<8x3xf32, #tpu.memory_space<vmem>>, vector<8x3xf32>,
    return
  }
}

</mosaic_0001>

<bundles_post_ra>
// kernel: tpu_custom_call.1
= control target key start
LH: loop header
LB: loop body
LE: loop exit
PB: predicated region body
PF: predicated region fallthrough
CT: control target
= control target key end

     0   :  { %vm27_vm0 = vcmask 1044480   ;;  %vm23_vm1 = vcmask 39936   ;;  %v119_v0 = vmov 0.0   ;;  %vm120_vm2 = vmmov 0   ;;  %s153_s1 = inlined_call_operand.vmem [shape: f32[5,3], index: 1, kind: input, shape index: {}]   ;;  %s154_s0 = inlined_call_operand.vmem [shape: f32[8,5], index: 0, kind: input, shape index: {}]   ;;  %s155_s2 = inlined_call_operand.vmem [shape: f32[1,3], index: 2, kind: input, shape index: {}]   ;;  %s156_s3 = inlined_call_operand.vmem [shape: f32[8,3], index: 3, kind: output, shape index: {}]  }
   0x1   :  { %112 = vmatprep.subr.mxu0 %v119_v0  ;;  %v15_v1 = vld [vmem:[%s153_s1] sm:$0x1f]  ;;  %114 = vmatprep.mubr.msk.f32.mxu0 %vm120_vm2, %v119_v0  ;;  %vm101_vm3 = vcmask 23552  }
   0x2   :  { %v14_v2 = vld [vmem:[%s154_s0] sm:$0xff]  ;;  %113 = vmatpush3.msk.msra.mxu0 %vm27_vm0, %v15_v1 }
   0x3   :  { %115 = vmatmul.mubr.msk.f32.vlgmr.msra.gmra.mrb[0].mxu0 %vm23_vm1, %v14_v2  ;;  %v107_v3 = vld [vmem:[%s155_s2] ss:$0 sm:$0xff] }
  0xd6   :  { %v97_v4 = vpop.f32.mrb[0].mxu0 }
  0xd7   :  { %v98_v5 = vadd.f32 %v107_v3, %v97_v4  ;;  %v116_v6 = vpop.f32.mrb[1].mxu0 }
  0xd9   :  { %102 = vst.msk [vmem:[%s156_s3] sm:$0xff] %vm101_vm3, %v98_v5 }

</bundles_post_ra>
